<compile_context>
chip_gen: v5e
topology: v5e:2x2
jax: 0.10.0
libtpu: 0.0.40
codegen_flags: <defaults>
</compile_context>

<pallas_src>
import functools

import jax
import jax.numpy as jnp
from jax.experimental import pallas as pl
from jax.experimental.pallas import tpu as pltpu


_LANE = 128  # pad the 3-wide output projection to this many columns (lane-dense)


def _round_up(x, m):
    return (x + m - 1) // m * m


# ---------------------------------------------------------------------------
# Fused PointGenCon kernel: 4 x (1x1 conv), BN folded, relu x3 + tanh.
# ---------------------------------------------------------------------------
def _pointgencon_kernel(
    x_ref,
    w1_ref, t1_ref,
    w2_ref, t2_ref,
    w3_ref, t3_ref,
    w4_ref, b4_ref,
    o_ref,
):
    cd = w1_ref.dtype  # MXU compute dtype (bf16)

    h = x_ref[...]  # (tile_m, C0), already in compute dtype
    # layer 1: C0 -> C0      (BN scale folded into w1; f32 shift t1)
    h = jnp.dot(h, w1_ref[...], preferred_element_type=jnp.float32)
    h = jnp.maximum(h + t1_ref[...], 0.0)
    # layer 2: C0 -> C0 // 2
    h = jnp.dot(h.astype(cd), w2_ref[...], preferred_element_type=jnp.float32)
    h = jnp.maximum(h + t2_ref[...], 0.0)
    # layer 3: C0 // 2 -> C0 // 4
    h = jnp.dot(h.astype(cd), w3_ref[...], preferred_element_type=jnp.float32)
    h = jnp.maximum(h + t3_ref[...], 0.0)
    # layer 4: C0 // 4 -> 128 (zero-padded from 3), tanh; lane-dense store.
    h = jnp.dot(h.astype(cd), w4_ref[...], preferred_element_type=jnp.float32)
    o_ref[...] = jnp.tanh(h + b4_ref[...]).astype(o_ref.dtype)


def pointgencon_forward(x2d, kparams, tile_m=256):
    """x2d: (M, C0) channels-last points -> (M, 3) f32."""
    (w1, t1, w2, t2, w3, t3, w4p, b4p) = kparams
    M, C0 = x2d.shape
    C1 = w1.shape[1]
    C2 = w2.shape[1]
    C3 = w3.shape[1]
    C4P = w4p.shape[1]  # padded output width (lane-dense)

    # Row tile: large by default (MXU-bound), never larger than the 8-aligned
    # problem; pad M up to a tile multiple (padded rows are sliced off below).
    tm = min(tile_m, _round_up(M, 8))
    m_pad = _round_up(M, tm)
    x2d = x2d.astype(w1.dtype)
    if m_pad != M:
        x2d = jnp.pad(x2d, ((0, m_pad - M), (0, 0)))

    full = lambda shp: pl.BlockSpec(shp, lambda i: (0, 0))

    out = pl.pallas_call(
        _pointgencon_kernel,
        out_shape=jax.ShapeDtypeStruct((m_pad, C4P), jnp.float32),
        grid_spec=pltpu.PrefetchScalarGridSpec(
            num_scalar_prefetch=0,
            grid=(m_pad // tm,),
            in_specs=[
                pl.BlockSpec((tm, C0), lambda i: (i, 0)),
                full((C0, C1)), full((1, C1)),
                full((C1, C2)), full((1, C2)),
                full((C2, C3)), full((1, C3)),
                full((C3, C4P)), full((1, C4P)),
            ],
            out_specs=pl.BlockSpec((tm, C4P), lambda i: (i, 0)),
        ),
        compiler_params=pltpu.CompilerParams(
            dimension_semantics=("parallel",),
            # NOTE: for very large bottleneck sizes (e.g. 2500+2) raise
            # vmem_limit_bytes so the double-buffered weight slabs fit.
        ),
    )(x2d, w1, t1, w2, t2, w3, t3, w4p, b4p)

    return out[:M, :3]


# ---------------------------------------------------------------------------
# Parameter construction / preparation.
# ---------------------------------------------------------------------------
def _fold_bn(w, conv_b, gamma, beta, running_mean, running_var, eps=1e-5):
    """Fold eval-mode BatchNorm1d into the conv weight columns + a shift."""
    scale = gamma / jnp.sqrt(running_var + eps)
    w_folded = w * scale[None, :]
    shift = (conv_b - running_mean) * scale + beta
    return w_folded, shift[None, :]


def make_pointgencon_params(key, bottleneck_size):
    """Deterministic synthetic parameters matching PointGenCon.__init__.

    Conv1d(k=1) weight (C_out, C_in, 1) is stored pre-transposed as (C_in,
    C_out) so the kernel computes X @ W.  BatchNorm uses its default init
    (gamma=1, beta=0, running stats 0/1) in eval mode and is folded in.
    Returns f32 reference params: (w1, t1, w2, t2, w3, t3, w4, b4).
    """
    C0 = bottleneck_size
    C1 = C0
    C2 = C0 // 2
    C3 = C0 // 4

    keys = jax.random.split(key, 8)

    def conv(kw, kb, cin, cout):
        bound = float(cin) ** -0.5
        w = jax.random.uniform(kw, (cin, cout), jnp.float32, -bound, bound)
        b = jax.random.uniform(kb, (cout,), jnp.float32, -bound, bound)
        return w, b

    w1, b1 = conv(keys[0], keys[1], C0, C1)
    w2, b2 = conv(keys[2], keys[3], C1, C2)
    w3, b3 = conv(keys[4], keys[5], C2, C3)
    w4, b4 = conv(keys[6], keys[7], C3, 3)

    def bn_default(c):
        return (jnp.ones((c,), jnp.float32), jnp.zeros((c,), jnp.float32),
                jnp.zeros((c,), jnp.float32), jnp.ones((c,), jnp.float32))

    w1, t1 = _fold_bn(w1, b1, *bn_default(C1))
    w2, t2 = _fold_bn(w2, b2, *bn_default(C2))
    w3, t3 = _fold_bn(w3, b3, *bn_default(C3))

    return (w1, t1, w2, t2, w3, t3, w4, b4[None, :])


def prepare_kernel_params(params, compute_dtype=jnp.bfloat16, out_pad=_LANE):
    """Cast matmul weights to the MXU dtype and zero-pad the 3-wide head to
    `out_pad` output columns so the kernel's output store is lane-dense."""
    (w1, t1, w2, t2, w3, t3, w4, b4) = params
    C3, C4 = w4.shape
    w4p = jnp.zeros((C3, out_pad), jnp.float32).at[:, :C4].set(w4)
    b4p = jnp.zeros((1, out_pad), jnp.float32).at[:, :C4].set(b4)
    cd = compute_dtype
    return (w1.astype(cd), t1, w2.astype(cd), t2, w3.astype(cd), t3,
            w4p.astype(cd), b4p)


# ---------------------------------------------------------------------------
# Full PointCapsNetDecoder / CapsDecoder forward.
# ---------------------------------------------------------------------------
def pointcapsnet_decoder_forward(latent_caps, decoder_kparams, rand_grids,
                                 tile_m=256):
    """latent_caps: (B, Lc, V) f32; rand_grids: (P, B, Lc, 2) ~ U(0,1).

    Returns (out_cat (B, 3, P*Lc), out_mean (B, 3, Lc)) matching
    CapsDecoder.forward / PointCapsNetDecoder.forward.
    """
    B, Lc, V = latent_caps.shape
    P = len(decoder_kparams)
    outs = []
    for p in range(P):
        # PyTorch: cat((rand_grid, x.transpose(2,1)), dim=1) in NCL layout is
        # exactly this channels-last concat -> (B*Lc, V+2) slab, no transpose.
        slab = jnp.concatenate([rand_grids[p], latent_caps], axis=-1)
        slab = slab.reshape(B * Lc, V + 2)
        y = pointgencon_forward(slab, decoder_kparams[p], tile_m=tile_m)
        outs.append(jnp.transpose(y.reshape(B, Lc, 3), (0, 2, 1)))  # (B, 3, Lc)
    out_cat = jnp.concatenate(outs, axis=2)
    out_mean = jnp.mean(jnp.stack(outs, axis=0), axis=0)
    return out_cat, out_mean


# ---------------------------------------------------------------------------
# Plain-JAX references (same eval-mode-BN semantics).
# ---------------------------------------------------------------------------
def _pointgencon_reference(x2d, params, compute_dtype=jnp.float32):
    (w1, t1, w2, t2, w3, t3, w4, b4) = params
    cd = compute_dtype
    h = x2d.astype(cd)
    h = jnp.maximum(jnp.dot(h, w1.astype(cd), preferred_element_type=jnp.float32) + t1, 0.0)
    h = jnp.maximum(jnp.dot(h.astype(cd), w2.astype(cd), preferred_element_type=jnp.float32) + t2, 0.0)
    h = jnp.maximum(jnp.dot(h.astype(cd), w3.astype(cd), preferred_element_type=jnp.float32) + t3, 0.0)
    return jnp.tanh(jnp.dot(h.astype(cd), w4.astype(cd), preferred_element_type=jnp.float32) + b4)


def _decoder_reference(latent_caps, decoder_params, rand_grids,
                       compute_dtype=jnp.float32):
    B, Lc, V = latent_caps.shape
    P = len(decoder_params)
    outs = []
    for p in range(P):
        slab = jnp.concatenate([rand_grids[p], latent_caps], axis=-1)
        slab = slab.reshape(B * Lc, V + 2)
        y = _pointgencon_reference(slab, decoder_params[p], compute_dtype)
        outs.append(jnp.transpose(y.reshape(B, Lc, 3), (0, 2, 1)))
    return jnp.concatenate(outs, axis=2), jnp.mean(jnp.stack(outs, axis=0), axis=0)


if __name__ == "__main__":
    # Small shapes consistent with PointCapsNetDecoder:
    #   latent_capsules: (B, digit_caps_size, digit_vec_size)
    #   nb_primitives   = num_points // digit_caps_size
    #   PointGenCon bottleneck = digit_vec_size + 2
    B = 2
    DIGIT_CAPS_SIZE = 32      # latent_caps_size
    DIGIT_VEC_SIZE = 16       # latent_vec_size
    NUM_POINTS = 128
    P = NUM_POINTS // DIGIT_CAPS_SIZE  # 4 primitives

    key = jax.random.PRNGKey(0)
    k_x, k_g, k_p = jax.random.split(key, 3)
    latent_caps = jax.random.normal(
        k_x, (B, DIGIT_CAPS_SIZE, DIGIT_VEC_SIZE), jnp.float32)
    # TODO(synk): PyTorch draws rand_grid with the CUDA RNG inside forward();
    # here it is a deterministic U(0,1) tensor produced with jax.random.
    rand_grids = jax.random.uniform(
        k_g, (P, B, DIGIT_CAPS_SIZE, 2), jnp.float32)

    pkeys = jax.random.split(k_p, P)
    params_f32 = tuple(
        make_pointgencon_params(pkeys[i], DIGIT_VEC_SIZE + 2) for i in range(P))
    kparams = tuple(prepare_kernel_params(p) for p in params_f32)

    fwd = jax.jit(functools.partial(pointcapsnet_decoder_forward, tile_m=256))
    out_cat, out_mean = jax.block_until_ready(fwd(latent_caps, kparams, rand_grids))

    assert out_cat.shape == (B, 3, NUM_POINTS), out_cat.shape
    assert out_mean.shape == (B, 3, DIGIT_CAPS_SIZE), out_mean.shape

    # Tight check against a plain-JAX reference using the same bf16 compute path.
    ref_cat_bf, _ = _decoder_reference(
        latent_caps, params_f32, rand_grids, jnp.bfloat16)
    assert jnp.allclose(out_cat, ref_cat_bf, atol=1e-2, rtol=1e-2), float(
        jnp.max(jnp.abs(out_cat - ref_cat_bf)))

    # Sanity check against the full-f32 reference (bf16 MXU tolerance).
    ref_cat, ref_mean = _decoder_reference(
        latent_caps, params_f32, rand_grids, jnp.float32)
    assert jnp.allclose(out_cat, ref_cat, atol=5e-2, rtol=5e-2), float(
        jnp.max(jnp.abs(out_cat - ref_cat)))
    assert jnp.allclose(out_mean, ref_mean, atol=5e-2, rtol=5e-2), float(
        jnp.max(jnp.abs(out_mean - ref_mean)))

    print("KERNEL_OK")
</pallas_src>

<mosaic_0001>
module attributes {stable_mosaic.version = 11 : i64} {
  func.func @_pointgencon_kernel(%arg0: i32, %arg1: memref<64x18xbf16, #tpu.memory_space<vmem>>, %arg2: memref<18x18xbf16, #tpu.memory_space<vmem>>, %arg3: memref<1x18xf32, #tpu.memory_space<vmem>>, %arg4: memref<18x9xbf16, #tpu.memory_space<vmem>>, %arg5: memref<1x9xf32, #tpu.memory_space<vmem>>, %arg6: memref<9x4xbf16, #tpu.memory_space<vmem>>, %arg7: memref<1x4xf32, #tpu.memory_space<vmem>>, %arg8: memref<4x128xbf16, #tpu.memory_space<vmem>>, %arg9: memref<1x128xf32, #tpu.memory_space<vmem>>, %arg10: memref<64x128xf32, #tpu.memory_space<vmem>>) attributes {dimension_semantics = [#tpu.dimension_semantics<parallel>], iteration_bounds = array<i64: 1>, scalar_prefetch = 0 : i64, scratch_operands = 0 : i64, tpu.core_type = #tpu.core_type<tc>, window_params = [{transform_indices = @transform_0, window_bounds = array<i64: 64, 18>}, {pipeline_mode = #tpu.pipeline_mode<synchronous>, transform_indices = @transform_1, window_bounds = array<i64: 18, 18>}, {pipeline_mode = #tpu.pipeline_mode<synchronous>, transform_indices = @transform_2, window_bounds = array<i64: 1, 18>}, {pipeline_mode = #tpu.pipeline_mode<synchronous>, transform_indices = @transform_3, window_bounds = array<i64: 18, 9>}, {pipeline_mode = #tpu.pipeline_mode<synchronous>, transform_indices = @transform_4, window_bounds = array<i64: 1, 9>}, {pipeline_mode = #tpu.pipeline_mode<synchronous>, transform_indices = @transform_5, window_bounds = array<i64: 9, 4>}, {pipeline_mode = #tpu.pipeline_mode<synchronous>, transform_indices = @transform_6, window_bounds = array<i64: 1, 4>}, {pipeline_mode = #tpu.pipeline_mode<synchronous>, transform_indices = @transform_7, window_bounds = array<i64: 4, 128>}, {pipeline_mode = #tpu.pipeline_mode<synchronous>, transform_indices = @transform_8, window_bounds = array<i64: 1, 128>}, {transform_indices = @transform_9, window_bounds = array<i64: 64, 128>}]} {
    %c0 = arith.constant 0 : index
    %c0_0 = arith.constant 0 : index
    %0 = vector.load %arg1[%c0, %c0_0] : memref<64x18xbf16, #tpu.memory_space<vmem>>, vector<64x18xbf16>
    %c0_1 = arith.constant 0 : index
    %c0_2 = arith.constant 0 : index
    %1 = vector.load %arg2[%c0_1, %c0_2] : memref<18x18xbf16, #tpu.memory_space<vmem>>, vector<18x18xbf16>
    %cst = arith.constant dense<0.000000e+00> : vector<64x18xf32>
    %2 = tpu.matmul %0, %1, %cst {dimension_numbers = #tpu.dot_dimension_numbers<[1], [0], [0], [1], [0, 0, 1, 1], [], []>} : vector<64x18xbf16>, vector<18x18xbf16>, vector<64x18xf32> -> vector<64x18xf32>
    %c0_3 = arith.constant 0 : index
    %c0_4 = arith.constant 0 : index
    %3 = vector.load %arg3[%c0_3, %c0_4] : memref<1x18xf32, #tpu.memory_space<vmem>>, vector<1x18xf32>
    %4 = vector.broadcast %3 : vector<1x18xf32> to vector<64x18xf32>
    %5 = arith.addf %2, %4 : vector<64x18xf32>
    %cst_5 = arith.constant 0.000000e+00 : f32
    %6 = vector.broadcast %cst_5 : f32 to vector<64x18xf32>
    %7 = arith.maximumf %5, %6 : vector<64x18xf32>
    %8 = arith.truncf %7 : vector<64x18xf32> to vector<64x18xbf16>
    %c0_6 = arith.constant 0 : index
    %c0_7 = arith.constant 0 : index
    %9 = vector.load %arg4[%c0_6, %c0_7] : memref<18x9xbf16, #tpu.memory_space<vmem>>, vector<18x9xbf16>
    %cst_8 = arith.constant dense<0.000000e+00> : vector<64x9xf32>
    %10 = tpu.matmul %8, %9, %cst_8 {dimension_numbers = #tpu.dot_dimension_numbers<[1], [0], [0], [1], [0, 0, 1, 1], [], []>} : vector<64x18xbf16>, vector<18x9xbf16>, vector<64x9xf32> -> vector<64x9xf32>
    %c0_9 = arith.constant 0 : index
    %c0_10 = arith.constant 0 : index
    %11 = vector.load %arg5[%c0_9, %c0_10] : memref<1x9xf32, #tpu.memory_space<vmem>>, vector<1x9xf32>
    %12 = vector.broadcast %11 : vector<1x9xf32> to vector<64x9xf32>
    %13 = arith.addf %10, %12 : vector<64x9xf32>
    %cst_11 = arith.constant 0.000000e+00 : f32
    %14 = vector.broadcast %cst_11 : f32 to vector<64x9xf32>
    %15 = arith.maximumf %13, %14 : vector<64x9xf32>
    %16 = arith.truncf %15 : vector<64x9xf32> to vector<64x9xbf16>
    %c0_12 = arith.constant 0 : index
    %c0_13 = arith.constant 0 : index
    %17 = vector.load %arg6[%c0_12, %c0_13] : memref<9x4xbf16, #tpu.memory_space<vmem>>, vector<9x4xbf16>
    %cst_14 = arith.constant dense<0.000000e+00> : vector<64x4xf32>
    %18 = tpu.matmul %16, %17, %cst_14 {dimension_numbers = #tpu.dot_dimension_numbers<[1], [0], [0], [1], [0, 0, 1, 1], [], []>} : vector<64x9xbf16>, vector<9x4xbf16>, vector<64x4xf32> -> vector<64x4xf32>
    %c0_15 = arith.constant 0 : index
    %c0_16 = arith.constant 0 : index
    %19 = vector.load %arg7[%c0_15, %c0_16] : memref<1x4xf32, #tpu.memory_space<vmem>>, vector<1x4xf32>
    %20 = vector.broadcast %19 : vector<1x4xf32> to vector<64x4xf32>
    %21 = arith.addf %18, %20 : vector<64x4xf32>
    %cst_17 = arith.constant 0.000000e+00 : f32
    %22 = vector.broadcast %cst_17 : f32 to vector<64x4xf32>
    %23 = arith.maximumf %21, %22 : vector<64x4xf32>
    %24 = arith.truncf %23 : vector<64x4xf32> to vector<64x4xbf16>
    %c0_18 = arith.constant 0 : index
    %c0_19 = arith.constant 0 : index
    %25 = vector.load %arg8[%c0_18, %c0_19] : memref<4x128xbf16, #tpu.memory_space<vmem>>, vector<4x128xbf16>
    %cst_20 = arith.constant dense<0.000000e+00> : vector<64x128xf32>
    %26 = tpu.matmul %24, %25, %cst_20 {dimension_numbers = #tpu.dot_dimension_numbers<[1], [0], [0], [1], [0, 0, 1, 1], [], []>} : vector<64x4xbf16>, vector<4x128xbf16>, vector<64x128xf32> -> vector<64x128xf32>
    %c0_21 = arith.constant 0 : index
    %c0_22 = arith.constant 0 : index
    %27 = vector.load %arg9[%c0_21, %c0_22] : memref<1x128xf32, #tpu.memory_space<vmem>>, vector<1x128xf32>
    %28 = vector.broadcast %27 : vector<1x128xf32> to vector<64x128xf32>
    %29 = arith.addf %26, %28 : vector<64x128xf32>
    %30 = math.tanh %29 : vector<64x128xf32>
    %c0_23 = arith.constant 0 : index
    %c0_24 = arith.constant 0 : index
    %31 = vector.load %arg10[%c0_23, %c0_24] : memref<64x128xf32, #tpu.memory_space<vmem>>, vector<64x128xf32>
    tpu.vector_store %arg10[%c0_23, %c0_24], %30 {strides = array<i32>} : memref<64x128xf32, #tpu.memory_space<vmem>>, vector<64x128xf32>,
    return
  }
  func.func @transform_0(%arg0: i32) -> (i32, i32) {
    %c0_i32 = arith.constant 0 : i32
    %c0_i32_0 = arith.constant 0 : i32
    return %arg0, %c0_i32 : i32, i32
  }
  func.func @transform_1(%arg0: i32) -> (i32, i32) {
    %c0_i32 = arith.constant 0 : i32
    %c0_i32_0 = arith.constant 0 : i32
    %c0_i32_1 = arith.constant 0 : i32
    return %c0_i32, %c0_i32_0 : i32, i32
  }
  func.func @transform_2(%arg0: i32) -> (i32, i32) {
    %c0_i32 = arith.constant 0 : i32
    %c0_i32_0 = arith.constant 0 : i32
    %c0_i32_1 = arith.constant 0 : i32
    return %c0_i32, %c0_i32_0 : i32, i32
  }
  func.func @transform_3(%arg0: i32) -> (i32, i32) {
    %c0_i32 = arith.constant 0 : i32
    %c0_i32_0 = arith.constant 0 : i32
    %c0_i32_1 = arith.constant 0 : i32
    return %c0_i32, %c0_i32_0 : i32, i32
  }
  func.func @transform_4(%arg0: i32) -> (i32, i32) {
    %c0_i32 = arith.constant 0 : i32
    %c0_i32_0 = arith.constant 0 : i32
    %c0_i32_1 = arith.constant 0 : i32
    return %c0_i32, %c0_i32_0 : i32, i32
  }
  func.func @transform_5(%arg0: i32) -> (i32, i32) {
    %c0_i32 = arith.constant 0 : i32
    %c0_i32_0 = arith.constant 0 : i32
    %c0_i32_1 = arith.constant 0 : i32
    return %c0_i32, %c0_i32_0 : i32, i32
  }
  func.func @transform_6(%arg0: i32) -> (i32, i32) {
    %c0_i32 = arith.constant 0 : i32
    %c0_i32_0 = arith.constant 0 : i32
    %c0_i32_1 = arith.constant 0 : i32
    return %c0_i32, %c0_i32_0 : i32, i32
  }
  func.func @transform_7(%arg0: i32) -> (i32, i32) {
    %c0_i32 = arith.constant 0 : i32
    %c0_i32_0 = arith.constant 0 : i32
    %c0_i32_1 = arith.constant 0 : i32
    return %c0_i32, %c0_i32_0 : i32, i32
  }
  func.func @transform_8(%arg0: i32) -> (i32, i32) {
    %c0_i32 = arith.constant 0 : i32
    %c0_i32_0 = arith.constant 0 : i32
    %c0_i32_1 = arith.constant 0 : i32
    return %c0_i32, %c0_i32_0 : i32, i32
  }
  func.func @transform_9(%arg0: i32) -> (i32, i32) {
    %c0_i32 = arith.constant 0 : i32
    %c0_i32_0 = arith.constant 0 : i32
    return %arg0, %c0_i32 : i32, i32
  }
}

</mosaic_0001>

<bundles_post_ra>
// kernel: pointcapsnet_decoder_forward.4
= control target key start
LH: loop header
LB: loop body
LE: loop exit
PB: predicated region body
PF: predicated region fallthrough
CT: control target
= control target key end

     0   :  { %vm90_vm0 = vcmask 1040384   ;;  %vm77_vm1 = vcmask 146432   ;;  %vm231_vm2 = vcmask 1043456   ;;  %vm232_vm3 = vcmask 1044480   ;;  %s560_s1 = inlined_call_operand.vmem [shape: bf16[18,18], index: 1, kind: input, shape index: {}]   ;;  %s561_s2 = inlined_call_operand.vmem [shape: f32[1,18], index: 2, kind: input, shape index: {}]   ;;  %s562_s0 = inlined_call_operand.vmem [shape: bf16[64,18], index: 0, kind: input, shape index: {}]   ;;  %s563_s4 = inlined_call_operand.vmem [shape: f32[1,9], index: 4, kind: input, shape index: {}]   ;;  %s564_s3 = inlined_call_operand.vmem [shape: bf16[18,9], index: 3, kind: input, shape index: {}]   ;;  %s565_s6 = inlined_call_operand.vmem [shape: f32[1,4], index: 6, kind: input, shape index: {}]   ;;  %s566_s5 = inlined_call_operand.vmem [shape: bf16[9,4], index: 5, kind: input, shape index: {}]   ;;  %s567_s8 = inlined_call_operand.vmem [shape: f32[1,128], index: 8, kind: input, shape index: {}]   ;;  %s568_s7 = inlined_call_operand.vmem [shape: bf16[4,128], index: 7, kind: input, shape index: {}]   ;;  %s569_s9 = inlined_call_operand.vmem [shape: f32[64,128], index: 9, kind: output, shape index: {}]  }
   0x1   :  { %v43_v0 = vld [vmem:[%s560_s1 + $0x8] sm:$0x1]  ;;  %v398_v4 = vld [vmem:[%s560_s1] sm:$0xff]  ;;  %v396_v7 = vld [vmem:[%s562_s0 + $0x10] sm:$0xff]  ;;  %v422_v46 = vmov 65535   ;;  %vm218_vm4 = vcmask 72704  }
   0x2   :  { %v73_v1 = vunpack.c.l.b16 %v43_v0  ;;  %v394_v5 = vld [vmem:[%s562_s0] sm:$0xff]  ;;  %v395_v6 = vld [vmem:[%s562_s0 + $0x8] sm:$0xff]  ;;  %v397_v8 = vld [vmem:[%s562_s0 + $0x18] sm:$0xff]  ;;  %v233_v47 = vsel %vm231_vm2, 4294967295, %v422_v46  ;;  %vm297_vm5 = vcmask 1041408   ;;  %vm284_vm6 = vcmask 31744  }
   0x3   :  { %v137_v9 = vld [vmem:[%s564_s3 + $0x8] sm:$0x1]  ;;  %v399_v13 = vld [vmem:[%s564_s3] sm:$0xff]  ;;  %v234_v48 = vsel %vm232_vm3, %v233_v47, 0 }
   0x4   :  { %v75_v2 = vpack.c.b16 %v73_v1, %v73_v1  ;;  %v147_v10 = vunpack.c.l.b16 %v137_v9  ;;  %v402_v15 = vld [vmem:[%s561_s2] ss:$0 sm:$0xff]  ;;  %v400_v44 = vld [vmem:[%s566_s5] sm:$0x10] }
   0x5   :  { %v384_v43 = vld [vmem:[%s566_s5] sm:$0xf] }
   0x6   :  { %v92_v3 = vsel %vm90_vm0, %v75_v2, 0  ;;  %v149_v11 = vpack.c.b16 %v147_v10, %v147_v10  ;;  %v385_v45 = vor.u32 %v400_v44, %v384_v43  ;;  %v403_v51 = vld [vmem:[%s563_s4] ss:$0 sm:$0xff] }
   0x7   :  { %100 = vmatpush.bf16.msra.mxu0 %v92_v3  ;;  %v405_v46 = vld [vmem:[%s567_s8] ss:$0 sm:$0xff] }
   0x8   :  { %v164_v12 = vsel %vm90_vm0, %v149_v11, 0  ;;  %v236_v49 = vand.u32 %v385_v45, %v234_v48 }
   0x9   :  { %172 = vmatpush.bf16.msra.mxu1 %v164_v12 }
   0xa   :  { %245 = vmatpush.bf16.msra.mxu2 %v236_v49 }
   0xb   :  { %101 = vmatpush.bf16.msra.mxu0 %v398_v4 }
   0xd   :  { %173 = vmatpush.bf16.msra.mxu1 %v399_v13 }
   0xe   :  { %370 = vmatmul.msk.bf16.vlgmr.msra.gmra.mxu0 %vm77_vm1, %v394_v5 }
  0x1e   :  { %371 = vmatmul.msk.bf16.gmra.mxu0 %vm77_vm1, %v395_v6 }
  0x2e   :  { %372 = vmatmul.msk.bf16.gmra.mxu0 %vm77_vm1, %v396_v7 }
  0x3e   :  { %373 = vmatmul.msk.bf16.gmra.mxu0 %vm77_vm1, %v397_v8 }
  0x8b   :  { %v103_v14 = vpop.f32.mrf.mxu0 }
  0x8c   :  { %v104_v16 = vadd.f32 %v402_v15, %v103_v14 }
  0x8e   :  { %v123_v19 = vmax.f32 %v104_v16, 0.0 }
  0x93   :  { %v105_v17 = vpop.f32.mrf.mxu0 }
  0x94   :  { %v106_v18 = vadd.f32 %v402_v15, %v105_v17 }
  0x96   :  { %v124_v20 = vmax.f32 %v106_v18, 0.0  ;;  %v404_v18 = vld [vmem:[%s565_s6] ss:$0 sm:$0xff] }
  0x98   :  { %v131_v21 = vpack.c.bf16 %v124_v20, %v123_v19 }
  0x9a   :  { %378 = vmatmul.msk.bf16.vlgmr.msra.gmra.mxu1 %vm77_vm1, %v131_v21 }
  0x9b   :  { %v108_v22 = vpop.f32.mrf.mxu0 }
  0x9c   :  { %v109_v23 = vadd.f32 %v402_v15, %v108_v22 }
  0x9e   :  { %v125_v26 = vmax.f32 %v109_v23, 0.0 }
  0xa3   :  { %v110_v24 = vpop.f32.mrf.mxu0 }
  0xa4   :  { %v111_v25 = vadd.f32 %v402_v15, %v110_v24 }
  0xa6   :  { %v126_v27 = vmax.f32 %v111_v25, 0.0 }
  0xa8   :  { %v132_v28 = vpack.c.bf16 %v126_v27, %v125_v26 }
  0xaa   :  { %379 = vmatmul.msk.bf16.gmra.mxu1 %vm77_vm1, %v132_v28 }
  0xab   :  { %v113_v29 = vpop.f32.mrf.mxu0 }
  0xac   :  { %v114_v30 = vadd.f32 %v402_v15, %v113_v29 }
  0xae   :  { %v127_v33 = vmax.f32 %v114_v30, 0.0 }
  0xb3   :  { %v115_v31 = vpop.f32.mrf.mxu0 }
  0xb4   :  { %v116_v32 = vadd.f32 %v402_v15, %v115_v31 }
  0xb6   :  { %v128_v34 = vmax.f32 %v116_v32, 0.0 }
  0xb8   :  { %v133_v35 = vpack.c.bf16 %v128_v34, %v127_v33 }
  0xba   :  { %380 = vmatmul.msk.bf16.gmra.mxu1 %vm77_vm1, %v133_v35 }
  0xbb   :  { %v118_v36 = vpop.f32.mrf.mxu0 }
  0xbc   :  { %v119_v37 = vadd.f32 %v402_v15, %v118_v36 }
  0xbe   :  { %v129_v40 = vmax.f32 %v119_v37, 0.0 }
  0xc3   :  { %v120_v38 = vpop.f32.mrf.mxu0 }
  0xc4   :  { %v121_v39 = vadd.f32 %v402_v15, %v120_v38  ;;  %v279_v15 = vld [vmem:[%s568_s7] sm:$0x3] }
  0xc5   :  { %v299_v16 = vsel %vm297_vm5, %v279_v15, 0 }
  0xc6   :  { %v130_v41 = vmax.f32 %v121_v39, 0.0  ;;  %308 = vmatpush.bf16.msra.mxu3 %v299_v16 }
  0xc8   :  { %v134_v42 = vpack.c.bf16 %v130_v41, %v129_v40 }
  0xca   :  { %381 = vmatmul.msk.bf16.gmra.mxu1 %vm77_vm1, %v134_v42 }
 0x117   :  { %v175_v50 = vpop.f32.mrf.mxu1 }
 0x118   :  { %v176_v52 = vadd.f32 %v403_v51, %v175_v50 }
 0x11a   :  { %v195_v55 = vmax.f32 %v176_v52, 0.0 }
 0x11f   :  { %v177_v53 = vpop.f32.mrf.mxu1 }
 0x120   :  { %v178_v54 = vadd.f32 %v403_v51, %v177_v53 }
 0x122   :  { %v196_v56 = vmax.f32 %v178_v54, 0.0 }
 0x124   :  { %v203_v57 = vpack.c.bf16 %v196_v56, %v195_v55 }
 0x126   :  { %386 = vmatmul.msk.bf16.vlgmr.msra.gmra.mxu2 %vm218_vm4, %v203_v57 }
 0x127   :  { %v180_v58 = vpop.f32.mrf.mxu1 }
 0x128   :  { %v181_v59 = vadd.f32 %v403_v51, %v180_v58 }
 0x12a   :  { %v197_v62 = vmax.f32 %v181_v59, 0.0 }
 0x12f   :  { %v182_v60 = vpop.f32.mrf.mxu1 }
 0x130   :  { %v183_v61 = vadd.f32 %v403_v51, %v182_v60 }
 0x132   :  { %v198_v63 = vmax.f32 %v183_v61, 0.0 }
 0x134   :  { %v204_v0 = vpack.c.bf16 %v198_v63, %v197_v62 }
 0x136   :  { %387 = vmatmul.msk.bf16.gmra.mxu2 %vm218_vm4, %v204_v0 }
 0x137   :  { %v185_v1 = vpop.f32.mrf.mxu1 }
 0x138   :  { %v186_v2 = vadd.f32 %v403_v51, %v185_v1 }
 0x13a   :  { %v199_v5 = vmax.f32 %v186_v2, 0.0 }
 0x13f   :  { %v187_v3 = vpop.f32.mrf.mxu1 }
 0x140   :  { %v188_v4 = vadd.f32 %v403_v51, %v187_v3 }
 0x142   :  { %v200_v6 = vmax.f32 %v188_v4, 0.0 }
 0x144   :  { %v205_v7 = vpack.c.bf16 %v200_v6, %v199_v5 }
 0x146   :  { %388 = vmatmul.msk.bf16.gmra.mxu2 %vm218_vm4, %v205_v7 }
 0x147   :  { %v190_v8 = vpop.f32.mrf.mxu1 }
 0x148   :  { %v191_v9 = vadd.f32 %v403_v51, %v190_v8 }
 0x14a   :  { %v201_v12 = vmax.f32 %v191_v9, 0.0 }
 0x14f   :  { %v192_v10 = vpop.f32.mrf.mxu1 }
 0x150   :  { %v193_v11 = vadd.f32 %v403_v51, %v192_v10 }
 0x152   :  { %v202_v13 = vmax.f32 %v193_v11, 0.0 }
 0x154   :  { %v206_v14 = vpack.c.bf16 %v202_v13, %v201_v12 }
 0x156   :  { %389 = vmatmul.msk.bf16.gmra.mxu2 %vm218_vm4, %v206_v14 }
 0x1a9   :  { %v247_v17 = vpop.f32.mrf.mxu2 }
 0x1aa   :  { %v248_v19 = vadd.f32 %v404_v18, %v247_v17 }
 0x1ac   :  { %v267_v22 = vmax.f32 %v248_v19, 0.0 }
 0x1b1   :  { %v249_v20 = vpop.f32.mrf.mxu2 }
 0x1b2   :  { %v250_v21 = vadd.f32 %v404_v18, %v249_v20 }
 0x1b4   :  { %v268_v23 = vmax.f32 %v250_v21, 0.0 }
 0x1b6   :  { %v275_v24 = vpack.c.bf16 %v268_v23, %v267_v22 }
 0x1b8   :  { %390 = vmatmul.msk.bf16.vlgmr.msra.gmra.mxu3 %vm284_vm6, %v275_v24 }
 0x1b9   :  { %v252_v25 = vpop.f32.mrf.mxu2 }
 0x1ba   :  { %v253_v26 = vadd.f32 %v404_v18, %v252_v25 }
 0x1bc   :  { %v269_v29 = vmax.f32 %v253_v26, 0.0 }
 0x1c1   :  { %v254_v27 = vpop.f32.mrf.mxu2 }
 0x1c2   :  { %v255_v28 = vadd.f32 %v404_v18, %v254_v27 }
 0x1c4   :  { %v270_v30 = vmax.f32 %v255_v28, 0.0 }
 0x1c6   :  { %v276_v31 = vpack.c.bf16 %v270_v30, %v269_v29 }
 0x1c8   :  { %391 = vmatmul.msk.bf16.gmra.mxu3 %vm284_vm6, %v276_v31 }
 0x1c9   :  { %v257_v32 = vpop.f32.mrf.mxu2 }
 0x1ca   :  { %v258_v33 = vadd.f32 %v404_v18, %v257_v32 }
 0x1cc   :  { %v271_v36 = vmax.f32 %v258_v33, 0.0 }
 0x1d1   :  { %v259_v34 = vpop.f32.mrf.mxu2 }
 0x1d2   :  { %v260_v35 = vadd.f32 %v404_v18, %v259_v34 }
 0x1d4   :  { %v272_v37 = vmax.f32 %v260_v35, 0.0 }
 0x1d6   :  { %v277_v38 = vpack.c.bf16 %v272_v37, %v271_v36 }
 0x1d8   :  { %392 = vmatmul.msk.bf16.gmra.mxu3 %vm284_vm6, %v277_v38 }
 0x1d9   :  { %v262_v39 = vpop.f32.mrf.mxu2 }
 0x1da   :  { %v263_v40 = vadd.f32 %v404_v18, %v262_v39 }
 0x1dc   :  { %v273_v43 = vmax.f32 %v263_v40, 0.0 }
 0x1e1   :  { %v264_v41 = vpop.f32.mrf.mxu2 }
 0x1e2   :  { %v265_v42 = vadd.f32 %v404_v18, %v264_v41 }
 0x1e4   :  { %v274_v44 = vmax.f32 %v265_v42, 0.0 }
 0x1e6   :  { %v278_v45 = vpack.c.bf16 %v274_v44, %v273_v43 }
 0x1e8   :  { %393 = vmatmul.msk.bf16.gmra.mxu3 %vm284_vm6, %v278_v45 }
 0x23b   :  { %v310_v47 = vpop.f32.mrf.mxu3 }
 0x23c   :  { %v311_v48 = vadd.f32 %v405_v46, %v310_v47 }
 0x23e   :  { %406 = vtanh.f32 %v311_v48 }
 0x243   :  { %v312_v49 = vpop.f32.mrf.mxu3 }
 0x244   :  { %v407_v50 = vpop.eup %406  ;;  %v313_v51 = vadd.f32 %v405_v46, %v312_v49 }
 0x245   :  { %338 = vst [vmem:[%s569_s9] sm:$0xff] %v407_v50 }
 0x246   :  { %408 = vtanh.f32 %v313_v51 }
 0x24b   :  { %v315_v52 = vpop.f32.mrf.mxu3 }
 0x24c   :  { %v409_v53 = vpop.eup %408  ;;  %v316_v54 = vadd.f32 %v405_v46, %v315_v52 }
 0x24d   :  { %339 = vst [vmem:[%s569_s9 + $0x8] sm:$0xff] %v409_v53 }
 0x24e   :  { %410 = vtanh.f32 %v316_v54 }
 0x253   :  { %v317_v55 = vpop.f32.mrf.mxu3 }
 0x254   :  { %v411_v56 = vpop.eup %410  ;;  %v318_v57 = vadd.f32 %v405_v46, %v317_v55 }
 0x255   :  { %340 = vst [vmem:[%s569_s9 + $0x10] sm:$0xff] %v411_v56 }
 0x256   :  { %412 = vtanh.f32 %v318_v57 }
 0x25b   :  { %v320_v58 = vpop.f32.mrf.mxu3 }
 0x25c   :  { %v413_v59 = vpop.eup %412  ;;  %v321_v60 = vadd.f32 %v405_v46, %v320_v58 }
 0x25d   :  { %341 = vst [vmem:[%s569_s9 + $0x18] sm:$0xff] %v413_v59 }
 0x25e   :  { %414 = vtanh.f32 %v321_v60 }
 0x263   :  { %v322_v61 = vpop.f32.mrf.mxu3 }
 0x264   :  { %v415_v62 = vpop.eup %414  ;;  %v323_v63 = vadd.f32 %v405_v46, %v322_v61 }
 0x265   :  { %342 = vst [vmem:[%s569_s9 + $0x20] sm:$0xff] %v415_v62 }
 0x266   :  { %416 = vtanh.f32 %v323_v63 }
 0x26b   :  { %v325_v0 = vpop.f32.mrf.mxu3 }
 0x26c   :  { %v417_v1 = vpop.eup %416  ;;  %v326_v2 = vadd.f32 %v405_v46, %v325_v0 }
 0x26d   :  { %343 = vst [vmem:[%s569_s9 + $0x28] sm:$0xff] %v417_v1 }
 0x26e   :  { %418 = vtanh.f32 %v326_v2 }
 0x273   :  { %v327_v3 = vpop.f32.mrf.mxu3 }
 0x274   :  { %v419_v4 = vpop.eup %418  ;;  %v328_v5 = vadd.f32 %v405_v46, %v327_v3 }
 0x275   :  { %344 = vst [vmem:[%s569_s9 + $0x30] sm:$0xff] %v419_v4 }
 0x276   :  { %420 = vtanh.f32 %v328_v5 }
 0x27c   :  { %v421_v6 = vpop.eup %420 }
 0x27d   :  { %345 = vst [vmem:[%s569_s9 + $0x38] sm:$0xff] %v421_v6 }

</bundles_post_ra>
